<compile_context>
chip_gen: v5e
topology: v5e:2x2
jax: 0.10.0
libtpu: 0.0.40
codegen_flags: <defaults>
</compile_context>

<pallas_src>
import functools

import jax
import jax.numpy as jnp
from jax.experimental import pallas as pl
from jax.experimental.pallas import tpu as pltpu


POOLING_COUNTS = (7, 4)   # mirrors SparseMaxPool(pooling_counts, N)
SEQ_N = 16                # N


def _build_schedule(pooling_counts, n):
    """Static mirror of SparseMaxPool.__init__/forward in original-index space.

    Returns [(shifts, offset, spacing), ...] where at each step
        new_val[i] = max over s in {0} U shifts of old_val[i + s]
                   = max(x[i : i + offset + 1])
    and the step writes map2d[i, i + offset] for i % spacing == 0, i < N - offset.
    """
    steps = []
    stride_mask = 1   # `stride` in the PyTorch mask-building loop
    spacing = 1       # spacing of valid start indices of the compacted sequence
    offset = 0
    reach = 0         # accumulated lane shift applied to the running value
    for gi, c in enumerate(pooling_counts):
        if gi > 0:
            stride_mask *= 2
        for k in range(c):
            if gi > 0 and k == 0:
                shifts = (spacing, 2 * spacing)   # nn.MaxPool1d(3, 2)
                spacing *= 2
            else:
                shifts = (spacing,)               # nn.MaxPool1d(2, 1)
            offset += stride_mask
            reach += max(shifts)
            # Wrap-safety of the circular roll: entries contaminated by wrap
            # (i >= N - reach) must be exactly the ones the mask excludes
            # (i < N - offset), which requires reach == offset at every step.
            assert reach == offset, (reach, offset)
            assert (spacing & (spacing - 1)) == 0, spacing    # power-of-two mask
            assert offset < n, f"pooling_counts give offset {offset} >= N={n}"
            steps.append((shifts, offset, spacing))
    return steps


def _sparse_max_pool_kernel(x_ref, out_ref, *, schedule, n, compute_dtype,
                            mxu_precision):
    # x_ref: (tr, N);  out_ref: (tr, N*N) with flat index f = i*N + j.
    nn_ = n * n
    x = x_ref[...].astype(compute_dtype)

    # Flat-index helpers and the constant 0/1 spread matrix, built once per
    # block from iotas (shift/and for power-of-two N -> no int div/mod).
    f = jax.lax.broadcasted_iota(jnp.int32, (1, nn_), 1)
    fr = jax.lax.broadcasted_iota(jnp.int32, (n, nn_), 1)
    ir = jax.lax.broadcasted_iota(jnp.int32, (n, nn_), 0)
    if (n & (n - 1)) == 0:
        shift = n.bit_length() - 1
        ii = f >> shift                 # start index i (row of map2d)
        jj = f & (n - 1)                # end   index j (col of map2d)
        spread_mat = ((fr >> shift) == ir).astype(compute_dtype)
    else:
        ii = f // n
        jj = f - ii * n
        spread_mat = ((fr // n) == ir).astype(compute_dtype)

    # One MXU matmul replaces the old 16-step broadcast/select spread:
    #   sval[r, i*N + j] = x[r, i] for every j.
    # Each output lane has exactly one nonzero term, so the result is exact
    # (precision=HIGHEST avoids bf16 truncation of f32 values on the MXU).
    sval = jnp.dot(x, spread_mat, preferred_element_type=jnp.float32,
                   precision=mxu_precision).astype(compute_dtype)

    # Main diagonal: map2d[.., i, i] = x[.., i]; everything else starts at 0
    # (scalar zero operand -- no zeros_like materialization).
    out = jnp.where(ii == jj, sval, jnp.zeros((), sval.dtype))

    # Each step: new_val[i] = max over s in {0} U shifts of val[i + s], realised
    # in the flat layout as a cyclic lane roll by s*N (i -> i + s, j unchanged).
    # Wrapped tail entries (i >= N - offset) are always excluded by the mask.
    for shifts, offset, spacing in schedule:
        new_sval = sval
        for s in shifts:
            rolled = pltpu.roll(sval, shift=nn_ - s * n, axis=1)  # roll by -s*N
            new_sval = jnp.maximum(new_sval, rolled)
        sval = new_sval
        mask = ((jj - ii) == offset) & ((ii & (spacing - 1)) == 0) \
               & (ii < (n - offset))
        out = jnp.where(mask, sval, out)

    out_ref[...] = out.astype(out_ref.dtype)


def _pick_rows_block(rows, target_rows):
    """Largest divisor of `rows` that is a multiple of 8 (or == rows) and fits
    `target_rows`; prefers >= 2 grid blocks so both v7x TensorCores get work."""
    divs = [t for t in range(1, rows + 1) if rows % t == 0]
    ok = [t for t in divs if (t % 8 == 0 or t == rows) and t <= target_rows]
    if ok:
        tr = max(ok)
    else:
        mult8 = [t for t in divs if t % 8 == 0]
        tr = min(mult8) if mult8 else rows
    if rows // tr < 2:
        smaller = [t for t in divs if t % 8 == 0 and t < rows and t <= target_rows]
        if smaller:
            tr = max(smaller)
    return tr


def sparse_max_pool(x, pooling_counts):
    b, d, n = x.shape
    schedule = _build_schedule(pooling_counts, n)

    # bf16 inputs compute in bf16 (exact for max/select and the 0/1 matmul;
    # halves vregs on v6e/v7x, merely neutral on v5e).  Everything else in f32.
    # TODO(synk): integer inputs above 2^24 would lose precision on the f32 path.
    compute_dtype = jnp.bfloat16 if x.dtype == jnp.bfloat16 else jnp.float32
    mxu_precision = (jax.lax.Precision.HIGHEST
                     if compute_dtype == jnp.float32 else None)
    itemsize = 2 if compute_dtype == jnp.bfloat16 else 4

    rows = b * d
    x2 = x.reshape(rows, n)                      # free row-major collapse

    # ~2 MiB output blocks: amortizes per-grid-step overhead while leaving room
    # for the in-kernel temporaries + double-buffered I/O under 32 MiB VMEM.
    target_rows = max(8, (2 << 20) // (n * n * itemsize))
    tr = _pick_rows_block(rows, target_rows)
    grid = (rows // tr,)

    kernel = functools.partial(_sparse_max_pool_kernel, schedule=schedule, n=n,
                               compute_dtype=compute_dtype,
                               mxu_precision=mxu_precision)
    out_flat = pl.pallas_call(
        kernel,
        out_shape=jax.ShapeDtypeStruct((rows, n * n), x.dtype),
        grid=grid,
        in_specs=[pl.BlockSpec((tr, n), lambda r: (r, 0))],
        out_specs=pl.BlockSpec((tr, n * n), lambda r: (r, 0)),
        compiler_params=pltpu.CompilerParams(
            dimension_semantics=("parallel",),
            vmem_limit_bytes=32 * 1024 * 1024),
    )(x2)
    # Free row-major reshape back to the PyTorch (B, D, N, N) layout.
    return out_flat.reshape(b, d, n, n)


def _reference_sparse_max_pool(x, pooling_counts):
    """Pure-JAX line-by-line port of SparseMaxPool.forward (for verification)."""
    b, d, n = x.shape
    idx = jnp.arange(n)
    map2d = jnp.zeros((b, d, n, n), x.dtype).at[:, :, idx, idx].set(x)
    cur = x
    stride, offset = 1, 0
    for gi, c in enumerate(pooling_counts):
        for k in range(c):
            if gi == 0 or k > 0:
                cur = jnp.maximum(cur[:, :, :-1], cur[:, :, 1:])            # MaxPool1d(2,1)
            else:
                w = jnp.maximum(jnp.maximum(cur[:, :, :-2], cur[:, :, 1:-1]),
                                cur[:, :, 2:])
                cur = w[:, :, ::2]                                          # MaxPool1d(3,2)
            offset += stride
            i = jnp.arange(0, n - offset, stride)
            j = jnp.arange(offset, n, stride)
            map2d = map2d.at[:, :, i, j].set(cur)
        stride *= 2
    return map2d


if __name__ == "__main__":
    key = jax.random.PRNGKey(0)
    B, D, N = 2, 4, SEQ_N
    x = jax.random.normal(key, (B, D, N), dtype=jnp.float32)

    out = jax.block_until_ready(sparse_max_pool(x, POOLING_COUNTS))
    ref = jax.block_until_ready(_reference_sparse_max_pool(x, POOLING_COUNTS))

    assert out.shape == (B, D, N, N)
    assert jnp.allclose(out, ref, rtol=1e-5, atol=1e-6), \
        "Pallas SparseMaxPool mismatch vs reference"
    print("KERNEL_OK")
</pallas_src>

<mosaic_0001>
module attributes {stable_mosaic.version = 11 : i64} {
  func.func @_sparse_max_pool_kernel(%arg0: i32, %arg1: memref<8x16xf32, #tpu.memory_space<vmem>>, %arg2: memref<8x256xf32, #tpu.memory_space<vmem>>) attributes {dimension_semantics = [#tpu.dimension_semantics<parallel>], iteration_bounds = array<i64: 1>, scalar_prefetch = 0 : i64, scratch_operands = 0 : i64, tpu.core_type = #tpu.core_type<tc>, window_params = [{transform_indices = @transform_0, window_bounds = array<i64: 8, 16>}, {transform_indices = @transform_1, window_bounds = array<i64: 8, 256>}]} {
    %c0 = arith.constant 0 : index
    %c0_0 = arith.constant 0 : index
    %0 = vector.load %arg1[%c0, %c0_0] : memref<8x16xf32, #tpu.memory_space<vmem>>, vector<8x16xf32>
    %1 = tpu.iota {dimensions = array<i32: 1>} : vector<1x256xi32>
    %2 = tpu.iota {dimensions = array<i32: 1>} : vector<16x256xi32>
    %3 = tpu.iota {dimensions = array<i32: 0>} : vector<16x256xi32>
    %c4_i32 = arith.constant 4 : i32
    %4 = vector.broadcast %c4_i32 : i32 to vector<1x256xi32>
    %5 = arith.shrsi %1, %4 : vector<1x256xi32>
    %c15_i32 = arith.constant 15 : i32
    %6 = vector.broadcast %c15_i32 : i32 to vector<1x256xi32>
    %7 = arith.andi %1, %6 : vector<1x256xi32>
    %c4_i32_1 = arith.constant 4 : i32
    %8 = vector.broadcast %c4_i32_1 : i32 to vector<16x256xi32>
    %9 = arith.shrsi %2, %8 : vector<16x256xi32>
    %10 = arith.cmpi eq, %9, %3 : vector<16x256xi32>
    %11 = arith.extui %10 : vector<16x256xi1> to vector<16x256xi32>
    %12 = arith.sitofp %11 : vector<16x256xi32> to vector<16x256xf32>
    %cst = arith.constant dense<0.000000e+00> : vector<8x256xf32>
    %13 = tpu.matmul %0, %12, %cst {dimension_numbers = #tpu.dot_dimension_numbers<[1], [0], [0], [1], [0, 0, 1, 1], [], []>, precision = #tpu.contract_precision<fp32>} : vector<8x16xf32>, vector<16x256xf32>, vector<8x256xf32> -> vector<8x256xf32>
    %14 = arith.cmpi eq, %5, %7 : vector<1x256xi32>
    %cst_2 = arith.constant 0.000000e+00 : f32
    %15 = vector.shape_cast %14 : vector<1x256xi1> to vector<1x256xi1>
    %16 = vector.broadcast %15 : vector<1x256xi1> to vector<8x256xi1>
    %17 = vector.broadcast %cst_2 : f32 to vector<8x256xf32>
    %18 = arith.select %16, %13, %17 : vector<8x256xi1>, vector<8x256xf32>
    %c240_i32 = arith.constant 240 : i32
    %19 = tpu.dynamic_rotate %13 by %c240_i32 dim 1 : vector<8x256xf32>, i32 -> vector<8x256xf32>
    %20 = arith.maximumf %13, %19 : vector<8x256xf32>
    %21 = arith.subi %7, %5 : vector<1x256xi32>
    %c1_i32 = arith.constant 1 : i32
    %22 = vector.broadcast %c1_i32 : i32 to vector<1x256xi32>
    %23 = arith.cmpi eq, %21, %22 : vector<1x256xi32>
    %c0_i32 = arith.constant 0 : i32
    %24 = vector.broadcast %c0_i32 : i32 to vector<1x256xi32>
    %25 = arith.andi %5, %24 : vector<1x256xi32>
    %c0_i32_3 = arith.constant 0 : i32
    %26 = vector.broadcast %c0_i32_3 : i32 to vector<1x256xi32>
    %27 = arith.cmpi eq, %25, %26 : vector<1x256xi32>
    %28 = arith.andi %23, %27 : vector<1x256xi1>
    %c15_i32_4 = arith.constant 15 : i32
    %29 = vector.broadcast %c15_i32_4 : i32 to vector<1x256xi32>
    %30 = arith.cmpi slt, %5, %29 : vector<1x256xi32>
    %31 = arith.andi %28, %30 : vector<1x256xi1>
    %32 = vector.shape_cast %31 : vector<1x256xi1> to vector<1x256xi1>
    %33 = vector.broadcast %32 : vector<1x256xi1> to vector<8x256xi1>
    %34 = arith.select %33, %20, %18 : vector<8x256xi1>, vector<8x256xf32>
    %c240_i32_5 = arith.constant 240 : i32
    %35 = tpu.dynamic_rotate %20 by %c240_i32_5 dim 1 : vector<8x256xf32>, i32 -> vector<8x256xf32>
    %36 = arith.maximumf %20, %35 : vector<8x256xf32>
    %37 = arith.subi %7, %5 : vector<1x256xi32>
    %c2_i32 = arith.constant 2 : i32
    %38 = vector.broadcast %c2_i32 : i32 to vector<1x256xi32>
    %39 = arith.cmpi eq, %37, %38 : vector<1x256xi32>
    %c0_i32_6 = arith.constant 0 : i32
    %40 = vector.broadcast %c0_i32_6 : i32 to vector<1x256xi32>
    %41 = arith.andi %5, %40 : vector<1x256xi32>
    %c0_i32_7 = arith.constant 0 : i32
    %42 = vector.broadcast %c0_i32_7 : i32 to vector<1x256xi32>
    %43 = arith.cmpi eq, %41, %42 : vector<1x256xi32>
    %44 = arith.andi %39, %43 : vector<1x256xi1>
    %c14_i32 = arith.constant 14 : i32
    %45 = vector.broadcast %c14_i32 : i32 to vector<1x256xi32>
    %46 = arith.cmpi slt, %5, %45 : vector<1x256xi32>
    %47 = arith.andi %44, %46 : vector<1x256xi1>
    %48 = vector.shape_cast %47 : vector<1x256xi1> to vector<1x256xi1>
    %49 = vector.broadcast %48 : vector<1x256xi1> to vector<8x256xi1>
    %50 = arith.select %49, %36, %34 : vector<8x256xi1>, vector<8x256xf32>
    %c240_i32_8 = arith.constant 240 : i32
    %51 = tpu.dynamic_rotate %36 by %c240_i32_8 dim 1 : vector<8x256xf32>, i32 -> vector<8x256xf32>
    %52 = arith.maximumf %36, %51 : vector<8x256xf32>
    %53 = arith.subi %7, %5 : vector<1x256xi32>
    %c3_i32 = arith.constant 3 : i32
    %54 = vector.broadcast %c3_i32 : i32 to vector<1x256xi32>
    %55 = arith.cmpi eq, %53, %54 : vector<1x256xi32>
    %c0_i32_9 = arith.constant 0 : i32
    %56 = vector.broadcast %c0_i32_9 : i32 to vector<1x256xi32>
    %57 = arith.andi %5, %56 : vector<1x256xi32>
    %c0_i32_10 = arith.constant 0 : i32
    %58 = vector.broadcast %c0_i32_10 : i32 to vector<1x256xi32>
    %59 = arith.cmpi eq, %57, %58 : vector<1x256xi32>
    %60 = arith.andi %55, %59 : vector<1x256xi1>
    %c13_i32 = arith.constant 13 : i32
    %61 = vector.broadcast %c13_i32 : i32 to vector<1x256xi32>
    %62 = arith.cmpi slt, %5, %61 : vector<1x256xi32>
    %63 = arith.andi %60, %62 : vector<1x256xi1>
    %64 = vector.shape_cast %63 : vector<1x256xi1> to vector<1x256xi1>
    %65 = vector.broadcast %64 : vector<1x256xi1> to vector<8x256xi1>
    %66 = arith.select %65, %52, %50 : vector<8x256xi1>, vector<8x256xf32>
    %c240_i32_11 = arith.constant 240 : i32
    %67 = tpu.dynamic_rotate %52 by %c240_i32_11 dim 1 : vector<8x256xf32>, i32 -> vector<8x256xf32>
    %68 = arith.maximumf %52, %67 : vector<8x256xf32>
    %69 = arith.subi %7, %5 : vector<1x256xi32>
    %c4_i32_12 = arith.constant 4 : i32
    %70 = vector.broadcast %c4_i32_12 : i32 to vector<1x256xi32>
    %71 = arith.cmpi eq, %69, %70 : vector<1x256xi32>
    %c0_i32_13 = arith.constant 0 : i32
    %72 = vector.broadcast %c0_i32_13 : i32 to vector<1x256xi32>
    %73 = arith.andi %5, %72 : vector<1x256xi32>
    %c0_i32_14 = arith.constant 0 : i32
    %74 = vector.broadcast %c0_i32_14 : i32 to vector<1x256xi32>
    %75 = arith.cmpi eq, %73, %74 : vector<1x256xi32>
    %76 = arith.andi %71, %75 : vector<1x256xi1>
    %c12_i32 = arith.constant 12 : i32
    %77 = vector.broadcast %c12_i32 : i32 to vector<1x256xi32>
    %78 = arith.cmpi slt, %5, %77 : vector<1x256xi32>
    %79 = arith.andi %76, %78 : vector<1x256xi1>
    %80 = vector.shape_cast %79 : vector<1x256xi1> to vector<1x256xi1>
    %81 = vector.broadcast %80 : vector<1x256xi1> to vector<8x256xi1>
    %82 = arith.select %81, %68, %66 : vector<8x256xi1>, vector<8x256xf32>
    %c240_i32_15 = arith.constant 240 : i32
    %83 = tpu.dynamic_rotate %68 by %c240_i32_15 dim 1 : vector<8x256xf32>, i32 -> vector<8x256xf32>
    %84 = arith.maximumf %68, %83 : vector<8x256xf32>
    %85 = arith.subi %7, %5 : vector<1x256xi32>
    %c5_i32 = arith.constant 5 : i32
    %86 = vector.broadcast %c5_i32 : i32 to vector<1x256xi32>
    %87 = arith.cmpi eq, %85, %86 : vector<1x256xi32>
    %c0_i32_16 = arith.constant 0 : i32
    %88 = vector.broadcast %c0_i32_16 : i32 to vector<1x256xi32>
    %89 = arith.andi %5, %88 : vector<1x256xi32>
    %c0_i32_17 = arith.constant 0 : i32
    %90 = vector.broadcast %c0_i32_17 : i32 to vector<1x256xi32>
    %91 = arith.cmpi eq, %89, %90 : vector<1x256xi32>
    %92 = arith.andi %87, %91 : vector<1x256xi1>
    %c11_i32 = arith.constant 11 : i32
    %93 = vector.broadcast %c11_i32 : i32 to vector<1x256xi32>
    %94 = arith.cmpi slt, %5, %93 : vector<1x256xi32>
    %95 = arith.andi %92, %94 : vector<1x256xi1>
    %96 = vector.shape_cast %95 : vector<1x256xi1> to vector<1x256xi1>
    %97 = vector.broadcast %96 : vector<1x256xi1> to vector<8x256xi1>
    %98 = arith.select %97, %84, %82 : vector<8x256xi1>, vector<8x256xf32>
    %c240_i32_18 = arith.constant 240 : i32
    %99 = tpu.dynamic_rotate %84 by %c240_i32_18 dim 1 : vector<8x256xf32>, i32 -> vector<8x256xf32>
    %100 = arith.maximumf %84, %99 : vector<8x256xf32>
    %101 = arith.subi %7, %5 : vector<1x256xi32>
    %c6_i32 = arith.constant 6 : i32
    %102 = vector.broadcast %c6_i32 : i32 to vector<1x256xi32>
    %103 = arith.cmpi eq, %101, %102 : vector<1x256xi32>
    %c0_i32_19 = arith.constant 0 : i32
    %104 = vector.broadcast %c0_i32_19 : i32 to vector<1x256xi32>
    %105 = arith.andi %5, %104 : vector<1x256xi32>
    %c0_i32_20 = arith.constant 0 : i32
    %106 = vector.broadcast %c0_i32_20 : i32 to vector<1x256xi32>
    %107 = arith.cmpi eq, %105, %106 : vector<1x256xi32>
    %108 = arith.andi %103, %107 : vector<1x256xi1>
    %c10_i32 = arith.constant 10 : i32
    %109 = vector.broadcast %c10_i32 : i32 to vector<1x256xi32>
    %110 = arith.cmpi slt, %5, %109 : vector<1x256xi32>
    %111 = arith.andi %108, %110 : vector<1x256xi1>
    %112 = vector.shape_cast %111 : vector<1x256xi1> to vector<1x256xi1>
    %113 = vector.broadcast %112 : vector<1x256xi1> to vector<8x256xi1>
    %114 = arith.select %113, %100, %98 : vector<8x256xi1>, vector<8x256xf32>
    %c240_i32_21 = arith.constant 240 : i32
    %115 = tpu.dynamic_rotate %100 by %c240_i32_21 dim 1 : vector<8x256xf32>, i32 -> vector<8x256xf32>
    %116 = arith.maximumf %100, %115 : vector<8x256xf32>
    %117 = arith.subi %7, %5 : vector<1x256xi32>
    %c7_i32 = arith.constant 7 : i32
    %118 = vector.broadcast %c7_i32 : i32 to vector<1x256xi32>
    %119 = arith.cmpi eq, %117, %118 : vector<1x256xi32>
    %c0_i32_22 = arith.constant 0 : i32
    %120 = vector.broadcast %c0_i32_22 : i32 to vector<1x256xi32>
    %121 = arith.andi %5, %120 : vector<1x256xi32>
    %c0_i32_23 = arith.constant 0 : i32
    %122 = vector.broadcast %c0_i32_23 : i32 to vector<1x256xi32>
    %123 = arith.cmpi eq, %121, %122 : vector<1x256xi32>
    %124 = arith.andi %119, %123 : vector<1x256xi1>
    %c9_i32 = arith.constant 9 : i32
    %125 = vector.broadcast %c9_i32 : i32 to vector<1x256xi32>
    %126 = arith.cmpi slt, %5, %125 : vector<1x256xi32>
    %127 = arith.andi %124, %126 : vector<1x256xi1>
    %128 = vector.shape_cast %127 : vector<1x256xi1> to vector<1x256xi1>
    %129 = vector.broadcast %128 : vector<1x256xi1> to vector<8x256xi1>
    %130 = arith.select %129, %116, %114 : vector<8x256xi1>, vector<8x256xf32>
    %c240_i32_24 = arith.constant 240 : i32
    %131 = tpu.dynamic_rotate %116 by %c240_i32_24 dim 1 : vector<8x256xf32>, i32 -> vector<8x256xf32>
    %132 = arith.maximumf %116, %131 : vector<8x256xf32>
    %c224_i32 = arith.constant 224 : i32
    %133 = tpu.dynamic_rotate %116 by %c224_i32 dim 1 : vector<8x256xf32>, i32 -> vector<8x256xf32>
    %134 = arith.maximumf %132, %133 : vector<8x256xf32>
    %135 = arith.subi %7, %5 : vector<1x256xi32>
    %c9_i32_25 = arith.constant 9 : i32
    %136 = vector.broadcast %c9_i32_25 : i32 to vector<1x256xi32>
    %137 = arith.cmpi eq, %135, %136 : vector<1x256xi32>
    %c1_i32_26 = arith.constant 1 : i32
    %138 = vector.broadcast %c1_i32_26 : i32 to vector<1x256xi32>
    %139 = arith.andi %5, %138 : vector<1x256xi32>
    %c0_i32_27 = arith.constant 0 : i32
    %140 = vector.broadcast %c0_i32_27 : i32 to vector<1x256xi32>
    %141 = arith.cmpi eq, %139, %140 : vector<1x256xi32>
    %142 = arith.andi %137, %141 : vector<1x256xi1>
    %c7_i32_28 = arith.constant 7 : i32
    %143 = vector.broadcast %c7_i32_28 : i32 to vector<1x256xi32>
    %144 = arith.cmpi slt, %5, %143 : vector<1x256xi32>
    %145 = arith.andi %142, %144 : vector<1x256xi1>
    %146 = vector.shape_cast %145 : vector<1x256xi1> to vector<1x256xi1>
    %147 = vector.broadcast %146 : vector<1x256xi1> to vector<8x256xi1>
    %148 = arith.select %147, %134, %130 : vector<8x256xi1>, vector<8x256xf32>
    %c224_i32_29 = arith.constant 224 : i32
    %149 = tpu.dynamic_rotate %134 by %c224_i32_29 dim 1 : vector<8x256xf32>, i32 -> vector<8x256xf32>
    %150 = arith.maximumf %134, %149 : vector<8x256xf32>
    %151 = arith.subi %7, %5 : vector<1x256xi32>
    %c11_i32_30 = arith.constant 11 : i32
    %152 = vector.broadcast %c11_i32_30 : i32 to vector<1x256xi32>
    %153 = arith.cmpi eq, %151, %152 : vector<1x256xi32>
    %c1_i32_31 = arith.constant 1 : i32
    %154 = vector.broadcast %c1_i32_31 : i32 to vector<1x256xi32>
    %155 = arith.andi %5, %154 : vector<1x256xi32>
    %c0_i32_32 = arith.constant 0 : i32
    %156 = vector.broadcast %c0_i32_32 : i32 to vector<1x256xi32>
    %157 = arith.cmpi eq, %155, %156 : vector<1x256xi32>
    %158 = arith.andi %153, %157 : vector<1x256xi1>
    %c5_i32_33 = arith.constant 5 : i32
    %159 = vector.broadcast %c5_i32_33 : i32 to vector<1x256xi32>
    %160 = arith.cmpi slt, %5, %159 : vector<1x256xi32>
    %161 = arith.andi %158, %160 : vector<1x256xi1>
    %162 = vector.shape_cast %161 : vector<1x256xi1> to vector<1x256xi1>
    %163 = vector.broadcast %162 : vector<1x256xi1> to vector<8x256xi1>
    %164 = arith.select %163, %150, %148 : vector<8x256xi1>, vector<8x256xf32>
    %c224_i32_34 = arith.constant 224 : i32
    %165 = tpu.dynamic_rotate %150 by %c224_i32_34 dim 1 : vector<8x256xf32>, i32 -> vector<8x256xf32>
    %166 = arith.maximumf %150, %165 : vector<8x256xf32>
    %167 = arith.subi %7, %5 : vector<1x256xi32>
    %c13_i32_35 = arith.constant 13 : i32
    %168 = vector.broadcast %c13_i32_35 : i32 to vector<1x256xi32>
    %169 = arith.cmpi eq, %167, %168 : vector<1x256xi32>
    %c1_i32_36 = arith.constant 1 : i32
    %170 = vector.broadcast %c1_i32_36 : i32 to vector<1x256xi32>
    %171 = arith.andi %5, %170 : vector<1x256xi32>
    %c0_i32_37 = arith.constant 0 : i32
    %172 = vector.broadcast %c0_i32_37 : i32 to vector<1x256xi32>
    %173 = arith.cmpi eq, %171, %172 : vector<1x256xi32>
    %174 = arith.andi %169, %173 : vector<1x256xi1>
    %c3_i32_38 = arith.constant 3 : i32
    %175 = vector.broadcast %c3_i32_38 : i32 to vector<1x256xi32>
    %176 = arith.cmpi slt, %5, %175 : vector<1x256xi32>
    %177 = arith.andi %174, %176 : vector<1x256xi1>
    %178 = vector.shape_cast %177 : vector<1x256xi1> to vector<1x256xi1>
    %179 = vector.broadcast %178 : vector<1x256xi1> to vector<8x256xi1>
    %180 = arith.select %179, %166, %164 : vector<8x256xi1>, vector<8x256xf32>
    %c224_i32_39 = arith.constant 224 : i32
    %181 = tpu.dynamic_rotate %166 by %c224_i32_39 dim 1 : vector<8x256xf32>, i32 -> vector<8x256xf32>
    %182 = arith.maximumf %166, %181 : vector<8x256xf32>
    %183 = arith.subi %7, %5 : vector<1x256xi32>
    %c15_i32_40 = arith.constant 15 : i32
    %184 = vector.broadcast %c15_i32_40 : i32 to vector<1x256xi32>
    %185 = arith.cmpi eq, %183, %184 : vector<1x256xi32>
    %c1_i32_41 = arith.constant 1 : i32
    %186 = vector.broadcast %c1_i32_41 : i32 to vector<1x256xi32>
    %187 = arith.andi %5, %186 : vector<1x256xi32>
    %c0_i32_42 = arith.constant 0 : i32
    %188 = vector.broadcast %c0_i32_42 : i32 to vector<1x256xi32>
    %189 = arith.cmpi eq, %187, %188 : vector<1x256xi32>
    %190 = arith.andi %185, %189 : vector<1x256xi1>
    %c1_i32_43 = arith.constant 1 : i32
    %191 = vector.broadcast %c1_i32_43 : i32 to vector<1x256xi32>
    %192 = arith.cmpi slt, %5, %191 : vector<1x256xi32>
    %193 = arith.andi %190, %192 : vector<1x256xi1>
    %194 = vector.shape_cast %193 : vector<1x256xi1> to vector<1x256xi1>
    %195 = vector.broadcast %194 : vector<1x256xi1> to vector<8x256xi1>
    %196 = arith.select %195, %182, %180 : vector<8x256xi1>, vector<8x256xf32>
    %c0_44 = arith.constant 0 : index
    %c0_45 = arith.constant 0 : index
    %197 = vector.load %arg2[%c0_44, %c0_45] : memref<8x256xf32, #tpu.memory_space<vmem>>, vector<8x256xf32>
    tpu.vector_store %arg2[%c0_44, %c0_45], %196 {strides = array<i32>} : memref<8x256xf32, #tpu.memory_space<vmem>>, vector<8x256xf32>,
    return
  }
  func.func @transform_0(%arg0: i32) -> (i32, i32) {
    %c0_i32 = arith.constant 0 : i32
    %c0_i32_0 = arith.constant 0 : i32
    return %arg0, %c0_i32 : i32, i32
  }
  func.func @transform_1(%arg0: i32) -> (i32, i32) {
    %c0_i32 = arith.constant 0 : i32
    %c0_i32_0 = arith.constant 0 : i32
    return %arg0, %c0_i32 : i32, i32
  }
}

</mosaic_0001>

<bundles_post_ra>
// kernel: tpu_custom_call.1
= control target key start
LH: loop header
LB: loop body
LE: loop exit
PB: predicated region body
PF: predicated region fallthrough
CT: control target
= control target key end

     0   :  { %6 = vsyncpa [#allocation3], 0  ;;  %s1259_s0 = inlined_call_operand.hbm [shape: f32[8,16], index: 0, kind: input, shape index: {}]   ;;  %s1260_s1 = inlined_call_operand.hbm [shape: f32[8,256], index: 1, kind: output, shape index: {}]  }
   0x1   :  { %7 = vsyncpa [#allocation4], 0  ;;  %s13_s8 = sshll.u32 %s1259_s0, 4  ;;  %s713_s9 = smov [#allocation2]   ;;  %s14_s8 = int_to_ptr.hbm [resolvable:$true] %s13_s8 }
   0x2   :  { %s15_s10 = sshll.u32 %s713_s9, 4  ;;  %s16_s10 = int_to_ptr.vmem [resolvable:$true] %s15_s10 }
   0x3   :  { %18 = dma.hbm_to_vmem [thread:$0]  %s14_s8, 128, %s16_s10, [#allocation3]  }
   0x4   :  { %709 = dma.done.wait [#allocation3], 128  }
   0x5   :  { %710 = vsyncadd [#allocation3], 4294967168  ;;  %v24_v0 = vlaneseq  ;;  %vm46_vm0 = vcmask 130048   ;;  %v714_v7 = vmov 0.0   ;;  %v715_v10 = vmov 1.0   ;;  %v23_v11 = vld [vmem:[#allocation2] sm:$0xff] }
   0x6   :  { %v48_v14 = vsel %vm46_vm0, %v23_v11, 0  ;;  %s716_s0 = smov 112   ;;  %s717_s11 = smov 96  }
   0x7   :  { %v732_v1 = vand.u32 127, %v24_v0  ;;  %v734_v2 = vshrl.u32 %v24_v0, 7  ;;  %v68_v15 = vand.u32 4294901760, %v48_v14  ;;  %s718_s12 = smov [#allocation5]   ;;  %s629_s16 = sshll.u32 %s1260_s1, 4  ;;  %s630_s16 = int_to_ptr.hbm [resolvable:$true] %s629_s16 }
   0x8   :  { %s627_s13 = sshll.u32 %s718_s12, 4  ;;  %s628_s13 = int_to_ptr.vmem [resolvable:$true] %s627_s13 }
   0x9   :  { %v737_v3 = vadd.s32 128, %v732_v1  ;;  %v740_v4 = vadd.s32 8, %v734_v2  ;;  %v743_v5 = vshra.s32 %v732_v1, 4  ;;  %v69_v21 = vsub.f32 %v48_v14, %v68_v15 }
   0xa   :  { %vm380_vm5 = vcmp.lt.s32.totalorder %v732_v1, 112  ;;  %vm1261_vm6 = vcmp.lt.s32.totalorder %v732_v1, 96 }
   0xb   :  { %v746_v6 = vshra.s32 %v737_v3, 4  ;;  %vm36_vm1 = vcmp.eq.s32.totalorder %v743_v5, %v740_v4  ;;  %vm34_vm2 = vcmp.eq.s32.totalorder %v743_v5, %v734_v2  ;;  %v70_v26 = vand.u32 4294901760, %v69_v21 }
   0xc   :  { %v641_v8 = vsel %vm36_vm1, 1.0, %v714_v7  ;;  %v639_v9 = vsel %vm34_vm2, 1.0, %v714_v7  ;;  %645 = vmatpush.msk.msra.mxu3 %vm36_vm1, %v715_v10  ;;  %643 = vmatpush.msk.msra.mxu0 %vm36_vm1, %v715_v10  ;;  %vm389_vm9 = vcmp.lt.s32.totalorder %v743_v5, 15  ;;  %vm409_vm13 = vcmp.lt.s32.totalorder %v743_v5, 14 }
   0xd   :  { %v92_v12 = vsub.f32 %v641_v8, %v641_v8  ;;  %v98_v13 = vsub.f32 %v639_v9, %v639_v9  ;;  %vm37_vm3 = vcmp.eq.s32.totalorder %v746_v6, %v740_v4  ;;  %vm35_vm4 = vcmp.eq.s32.totalorder %v746_v6, %v734_v2 }
   0xe   :  { %646 = vmatpush.msk.msra.mxu3 %vm34_vm2, %v715_v10  ;;  %644 = vmatpush.msk.msra.mxu0 %vm34_vm2, %v715_v10  ;;  %v642_v16 = vsel %vm37_vm3, 1.0, %v714_v7  ;;  %v640_v20 = vsel %vm35_vm4, 1.0, %v714_v7  ;;  %v71_v31 = vsub.f32 %v69_v21, %v70_v26  ;;  %vm390_vm10 = vcmp.lt.s32.totalorder %v746_v6, 15 }
   0xf   :  { %124 = vmatpush.msra.mxu2 %v92_v12  ;;  %v93_v17 = vand.u32 4294901760, %v92_v12  ;;  %v99_v18 = vand.u32 4294901760, %v98_v13  ;;  %v251_v19 = vsub.f32 %v642_v16, %v642_v16  ;;  %v257_v22 = vsub.f32 %v640_v20, %v640_v20  ;;  %155 = vmatmul.f32.vlgmr.msra.gmra.mxu3 %v70_v26 }
  0x10   :  { %v72_v34 = vand.u32 4294901760, %v71_v31  ;;  %vm410_vm14 = vcmp.lt.s32.totalorder %v746_v6, 14  ;;  %vm510_vm12 = vcmp.lt.s32.totalorder %v746_v6, 9 }
  0x11   :  { %127 = vmatpush.msra.mxu2 %v98_v13  ;;  %v94_v23 = vsub.f32 %v92_v12, %v93_v17  ;;  %v100_v24 = vsub.f32 %v98_v13, %v99_v18  ;;  %176 = vmatpush.msrb.mxu0 %v93_v17  ;;  %v252_v25 = vand.u32 4294901760, %v251_v19  ;;  %v258_v27 = vand.u32 4294901760, %v257_v22 }
  0x12   :  { %130 = vmatmul.f32.vlgmr.msra.gmra.mxu2 %v69_v21  ;;  %73 = vmatmul.f32.vlgmr.msra.gmra.mxu0 %v72_v34 }
  0x13   :  { %v95_v28 = vand.u32 4294901760, %v94_v23  ;;  %649 = vmatpush.msk.msrb.mxu2 %vm37_vm3, %v715_v10  ;;  %v101_v29 = vand.u32 4294901760, %v100_v24  ;;  %v253_v30 = vsub.f32 %v251_v19, %v252_v25  ;;  %180 = vmatpush.msrb.mxu0 %v99_v18  ;;  %v259_v32 = vsub.f32 %v257_v22, %v258_v27 }
  0x15   :  { %96 = vmatpush.msra.mxu1 %v95_v28  ;;  %v254_v33 = vand.u32 4294901760, %v253_v30  ;;  %650 = vmatpush.msk.msrb.mxu2 %vm35_vm4, %v715_v10  ;;  %v260_v35 = vand.u32 4294901760, %v259_v32 }
  0x16   :  { %283 = vmatpush.msra.mxu0 %v251_v19 }
  0x17   :  { %335 = vmatpush.msra.mxu2 %v252_v25  ;;  %102 = vmatpush.msra.mxu1 %v101_v29 }
  0x18   :  { %255 = vmatpush.msrb.mxu3 %v254_v33  ;;  %104 = vmatmul.f32.vlgmr.msra.gmra.mxu1 %v68_v15 }
  0x19   :  { %647 = vmatpush.msk.msrb.mxu1 %vm36_vm1, %v715_v10  ;;  %339 = vmatpush.msra.mxu2 %v258_v27  ;;  %vm429_vm1 = vcmp.lt.s32.totalorder %v743_v5, 13 }
  0x1a   :  { %261 = vmatpush.msrb.mxu3 %v260_v35  ;;  %232 = vmatmul.f32.vlgmr.msrb.gmra.mxu2 %v72_v34 }
  0x1b   :  { %648 = vmatpush.msk.msrb.mxu1 %vm34_vm2, %v715_v10  ;;  %263 = vmatmul.f32.vlgmr.msrb.gmra.mxu3 %v68_v15  ;;  %vm430_vm2 = vcmp.lt.s32.totalorder %v746_v6, 13 }
  0x1c   :  { %653 = vmatpush.msk.msra.mxu3 %vm37_vm3, %v715_v10  ;;  %286 = vmatpush.msra.mxu0 %v257_v22 }
  0x1d   :  { %651 = vmatpush.msk.msra.mxu1 %vm37_vm3, %v715_v10  ;;  %182 = vmatmul.f32.vlgmr.msrb.gmra.mxu0 %v68_v15 }
  0x1e   :  { %654 = vmatpush.msk.msra.mxu3 %vm35_vm4, %v715_v10 }
  0x1f   :  { %652 = vmatpush.msk.msra.mxu1 %vm35_vm4, %v715_v10 }
  0x20   :  { %205 = vmatmul.f32.vlgmr.msrb.gmra.mxu1 %v68_v15 }
  0x22   :  { %341 = vmatmul.f32.vlgmr.msra.gmra.mxu2 %v68_v15 }
  0x23   :  { %364 = vmatmul.f32.vlgmr.msra.gmra.mxu3 %v68_v15 }
  0x25   :  { %289 = vmatmul.f32.vlgmr.msra.gmra.mxu0 %v69_v21 }
  0x28   :  { %314 = vmatmul.f32.vlgmr.msra.gmra.mxu1 %v70_v26 }
  0x8f   :  { %v74_v36 = vpop.f32.mrf.mxu0 }
  0x92   :  { %v156_v40 = vpop.f32.mrf.mxu3 }
  0x95   :  { %v105_v37 = vpop.f32.mrf.mxu1  ;;  %v131_v39 = vpop.f32.mrf.mxu2 }
  0x96   :  { %v106_v38 = vadd.f32 %v105_v37, %v74_v36 }
  0x98   :  { %v132_v41 = vadd.f32 %v131_v39, %v106_v38 }
  0x9a   :  { %v157_v42 = vadd.f32 %v156_v40, %v132_v41  ;;  %v183_v43 = vpop.f32.mrf.mxu0 }
  0x9c   :  { %v184_v45 = vadd.f32 %v183_v43, %v157_v42 }
  0x9d   :  { %v206_v44 = vpop.f32.mrf.mxu1  ;;  %v233_v46 = vpop.f32.mrf.mxu2 }
  0x9e   :  { %v804_v47 = vadd.f32 %v206_v44, %v184_v45  ;;  %v264_v48 = vpop.f32.mrf.mxu3 }
  0x9f   :  { %v265_v49 = vadd.f32 %v264_v48, %v233_v46 }
  0xa0   :  { %376 = vrot.lane.b32.xlu0 %v804_v47, %s716_s0 }
  0xa2   :  { %v290_v50 = vpop.f32.mrf.mxu0 }
  0xa3   :  { %v291_v52 = vadd.f32 %v290_v50, %v265_v49 }
  0xa5   :  { %v315_v51 = vpop.f32.mrf.mxu1  ;;  %v342_v53 = vpop.f32.mrf.mxu2 }
  0xa6   :  { %v316_v54 = vadd.f32 %v315_v51, %v291_v52  ;;  %v365_v55 = vpop.f32.mrf.mxu3 }
  0xa8   :  { %v343_v56 = vadd.f32 %v342_v53, %v316_v54 }
  0xaa   :  { %v808_v57 = vadd.f32 %v365_v55, %v343_v56 }
  0xac   :  { %378 = vrot.lane.b32.xlu0 %v808_v57, %s716_s0 }
 0x112   :  { %v377_v58 = vpop.permute.xlu0 %376 }
 0x11e   :  { %v379_v59 = vpop.permute.xlu0 %378 }
 0x11f   :  { %v381_v60 = vsel %vm380_vm5, %v377_v58, %v379_v59  ;;  %v382_v62 = vsel %vm380_vm5, %v379_v59, %v377_v58 }
 0x120   :  { %v816_v61 = vmax.f32 %v804_v47, %v381_v60  ;;  %v823_v63 = vmax.f32 %v808_v57, %v382_v62 }
 0x122   :  { %399 = vrot.lane.b32.xlu1 %v816_v61, %s716_s0 }
 0x12a   :  { %401 = vrot.lane.b32.xlu1 %v823_v63, %s716_s0 }
 0x194   :  { %v400_v0 = vpop.permute.xlu1 %399 }
 0x19c   :  { %v402_v2 = vpop.permute.xlu1 %401 }
 0x19d   :  { %v403_v4 = vsel %vm380_vm5, %v400_v0, %v402_v2  ;;  %v404_v8 = vsel %vm380_vm5, %v402_v2, %v400_v0 }
 0x19e   :  { %v830_v7 = vmax.f32 %v816_v61, %v403_v4  ;;  %v837_v9 = vmax.f32 %v823_v63, %v404_v8 }
 0x1a0   :  { %419 = vrot.lane.b32.xlu2 %v830_v7, %s716_s0 }
 0x1a8   :  { %421 = vrot.lane.b32.xlu2 %v837_v9, %s716_s0 }
 0x1fa   :  { %v420_v10 = vpop.permute.xlu2 %419 }
 0x202   :  { %v422_v11 = vpop.permute.xlu2 %421 }
 0x203   :  { %v423_v12 = vsel %vm380_vm5, %v420_v10, %v422_v11  ;;  %v424_v13 = vsel %vm380_vm5, %v422_v11, %v420_v10  ;;  %v32_v10 = vand.u32 15, %v732_v1  ;;  %v33_v11 = vand.u32 15, %v737_v3 }
 0x204   :  { %v846_v14 = vmax.f32 %v830_v7, %v423_v12  ;;  %v849_v15 = vmax.f32 %v837_v9, %v424_v13  ;;  %v538_v3 = vand.u32 1, %v743_v5 }
 0x205   :  { %v965_v12 = vsub.s32 %v32_v10, %v743_v5  ;;  %v968_v13 = vsub.s32 %v33_v11, %v746_v6 }
 0x206   :  { %441 = vrot.lane.b32.xlu1 %v849_v15, %s716_s0  ;;  %439 = vrot.lane.b32.xlu0 %v846_v14, %s716_s0 }
 0x207   :  { %vm387_vm7 = vcmp.eq.s32.totalorder %v965_v12, 1  ;;  %vm388_vm8 = vcmp.eq.s32.totalorder %v968_v13, 1  ;;  %vm407_vm11 = vcmp.eq.s32.totalorder %v965_v12, 2  ;;  %vm428_vm0 = vcmp.eq.s32.totalorder %v968_v13, 3 }
 0x208   :  { %vm993_vm15 = vmand %vm387_vm7, %vm389_vm9  ;;  %vm562_vm4 = vcmp.eq.s32.totalorder %v965_v12, 11 }
 0x209   :  { %vm1001_vm3 = vmand %vm388_vm8, %vm390_vm10  ;;  %vm1274_vm8 = vcmp.eq.s32.totalorder %v968_v13, 2  ;;  %vm509_vm10 = vcmp.lt.s32.totalorder %v743_v5, 9 }
 0x20a   :  { %vm1016_vm7 = vmand %vm407_vm11, %vm409_vm13  ;;  %vm1279_vm11 = vcmp.eq.s32.totalorder %v965_v12, 3 }
 0x20b   :  { %vm1024_vm9 = vmand %vm1274_vm8, %vm410_vm14  ;;  %vm508_vm8 = vcmp.eq.s32.totalorder %v968_v13, 7 }
 0x20c   :  { %vm1039_vm13 = vmand %vm1279_vm11, %vm429_vm1  ;;  %vm1284_vm1 = vcmp.lt.s32.totalorder %v743_v5, 12  ;;  %vm1285_vm11 = vcmp.eq.s32.totalorder %v965_v12, 4 }
 0x20d   :  { %vm1047_vm14 = vmand %vm428_vm0, %vm430_vm2  ;;  %vm1288_vm0 = vcmp.lt.s32.totalorder %v746_v6, 12  ;;  %vm1289_vm2 = vcmp.eq.s32.totalorder %v968_v13, 4 }
 0x278   :  { %v442_v16 = vpop.permute.xlu1 %441  ;;  %v440_v17 = vpop.permute.xlu0 %439 }
 0x279   :  { %v443_v18 = vsel %vm380_vm5, %v440_v17, %v442_v16  ;;  %v444_v19 = vsel %vm380_vm5, %v442_v16, %v440_v17  ;;  %v539_v16 = vand.u32 1, %v746_v6  ;;  %v1266_v17 = vmov 0 }
 0x27a   :  { %v860_v20 = vmax.f32 %v846_v14, %v443_v18  ;;  %v863_v21 = vmax.f32 %v849_v15, %v444_v19  ;;  %v1267_v17 = vsel %vm993_vm15, 4294967295, %v1266_v17  ;;  %v1268_v18 = vmov 0 }
 0x27b   :  { %v1269_v18 = vsel %vm1001_vm3, 4294967295, %v1268_v18  ;;  %v1270_v19 = vmov 0  ;;  %vm544_vm15 = vcmp.lt.s32.totalorder %v743_v5, 7 }
 0x27c   :  { %461 = vrot.lane.b32.xlu0 %v863_v21, %s716_s0  ;;  %459 = vrot.lane.b32.xlu2 %v860_v20, %s716_s0 }
 0x2d6   :  { %v460_v22 = vpop.permute.xlu2 %459 }
 0x2ee   :  { %v462_v23 = vpop.permute.xlu0 %461 }
 0x2ef   :  { %v463_v24 = vsel %vm380_vm5, %v460_v22, %v462_v23  ;;  %v464_v25 = vsel %vm380_vm5, %v462_v23, %v460_v22  ;;  %v1272_v22 = vmov 0  ;;  %v1275_v23 = vmov 0 }
 0x2f0   :  { %v874_v26 = vmax.f32 %v860_v20, %v463_v24  ;;  %v877_v27 = vmax.f32 %v863_v21, %v464_v25  ;;  %v1273_v22 = vsel %vm1016_vm7, 4294967295, %v1272_v22  ;;  %v1276_v23 = vsel %vm1024_vm9, 4294967295, %v1275_v23 }
 0x2f1   :  { %v1277_v24 = vmov 0  ;;  %v1280_v25 = vmov 0  ;;  %vm1300_vm9 = vcmp.eq.s32.totalorder %v968_v13, 5 }
 0x2f2   :  { %481 = vrot.lane.b32.xlu2 %v877_v27, %s716_s0  ;;  %479 = vrot.lane.b32.xlu1 %v874_v26, %s716_s0  ;;  %v1281_v25 = vsel %vm1039_vm13, 4294967295, %v1280_v25  ;;  %vm1059_vm13 = vmand %vm1285_vm11, %vm1284_vm1  ;;  %vm1292_vm1 = vcmp.eq.s32.totalorder %v965_v12, 9 }
 0x34c   :  { %v482_v28 = vpop.permute.xlu2 %481 }
 0x364   :  { %v480_v29 = vpop.permute.xlu1 %479 }
 0x365   :  { %v483_v30 = vsel %vm380_vm5, %v480_v29, %v482_v28  ;;  %v484_v31 = vsel %vm380_vm5, %v482_v28, %v480_v29  ;;  %v1282_v28 = vmov 0  ;;  %v1286_v29 = vmov 0 }
 0x366   :  { %v888_v32 = vmax.f32 %v874_v26, %v483_v30  ;;  %v891_v33 = vmax.f32 %v877_v27, %v484_v31  ;;  %v1283_v28 = vsel %vm1047_vm14, 4294967295, %v1282_v28  ;;  %v1287_v29 = vsel %vm1059_vm13, 4294967295, %v1286_v29  ;;  %vm1067_vm14 = vmand %vm1289_vm2, %vm1288_vm0 }
 0x367   :  { %v1290_v30 = vmov 0  ;;  %v1293_v31 = vmov 0  ;;  %vm1295_vm0 = vcmp.lt.s32.totalorder %v743_v5, 11  ;;  %vm1296_vm2 = vcmp.eq.s32.totalorder %v965_v12, 5 }
 0x368   :  { %501 = vrot.lane.b32.xlu1 %v891_v33, %s716_s0  ;;  %499 = vrot.lane.b32.xlu0 %v888_v32, %s716_s0  ;;  %v1291_v30 = vsel %vm1067_vm14, 4294967295, %v1290_v30  ;;  %vm1087_vm14 = vmand %vm1296_vm2, %vm1295_vm0  ;;  %vm1299_vm13 = vcmp.lt.s32.totalorder %v746_v6, 11  ;;  %vm545_vm0 = vcmp.lt.s32.totalorder %v746_v6, 7  ;;  %vm1304_vm2 = vcmp.lt.s32.totalorder %v743_v5, 10 }
 0x369   :  { %vm1095_vm7 = vmand %vm1300_vm9, %vm1299_vm13  ;;  %vm1308_vm9 = vcmp.lt.s32.totalorder %v746_v6, 10  ;;  %vm1309_vm13 = vcmp.eq.s32.totalorder %v968_v13, 6 }
 0x3da   :  { %v502_v34 = vpop.permute.xlu1 %501  ;;  %v500_v35 = vpop.permute.xlu0 %499 }
 0x3db   :  { %v503_v36 = vsel %vm380_vm5, %v500_v35, %v502_v34  ;;  %v504_v37 = vsel %vm380_vm5, %v502_v34, %v500_v35  ;;  %v1297_v34 = vmov 0  ;;  %v1301_v35 = vmov 0 }
 0x3dc   :  { %v902_v38 = vmax.f32 %v888_v32, %v503_v36  ;;  %v905_v39 = vmax.f32 %v891_v33, %v504_v37  ;;  %v1298_v34 = vsel %vm1087_vm14, 4294967295, %v1297_v34  ;;  %v1302_v35 = vsel %vm1095_vm7, 4294967295, %v1301_v35  ;;  %vm1117_vm7 = vmand %vm1309_vm13, %vm1308_vm9 }
 0x3dd   :  { %vm1305_vm14 = vcmp.eq.s32.totalorder %v965_v12, 6  ;;  %v1306_v36 = vmov 0  ;;  %v1310_v37 = vmov 0  ;;  %vm566_vm9 = vcmp.lt.s32.totalorder %v743_v5, 5 }
 0x3de   :  { %521 = vrot.lane.b32.xlu0 %v905_v39, %s716_s0  ;;  %527 = vrot.lane.b32.xlu1 %v902_v38, %s717_s11  ;;  %v1311_v37 = vsel %vm1117_vm7, 4294967295, %v1310_v37  ;;  %vm368_vm13 = vcmp.eq.s32.totalorder %v743_v5, %v32_v10  ;;  %vm369_vm7 = vcmp.eq.s32.totalorder %v746_v6, %v33_v11 }
 0x3df   :  { %519 = vrot.lane.b32.xlu2 %v902_v38, %s716_s0 }
 0x3e7   :  { %529 = vrot.lane.b32.xlu2 %v905_v39, %s717_s11 }
 0x439   :  { %v520_v40 = vpop.permute.xlu2 %519 }
 0x441   :  { %v530_v45 = vpop.permute.xlu2 %529 }
 0x450   :  { %v522_v41 = vpop.permute.xlu0 %521  ;;  %v528_v42 = vpop.permute.xlu1 %527 }
 0x451   :  { %v523_v43 = vsel %vm380_vm5, %v520_v40, %v522_v41  ;;  %v524_v44 = vsel %vm380_vm5, %v522_v41, %v520_v40  ;;  %v532_v49 = vsel %vm1261_vm6, %v528_v42, %v530_v45  ;;  %v533_v50 = vsel %vm1261_vm6, %v530_v45, %v528_v42 }
 0x452   :  { %v525_v46 = vmax.f32 %v902_v38, %v523_v43  ;;  %v526_v48 = vmax.f32 %v905_v39, %v524_v44  ;;  %vm1008_vm5 = vcmp.eq.s32.totalorder %v538_v3, 0  ;;  %v1313_v40 = vmov 0 }
 0x453   :  { %v1271_v19 = vsel %vm1008_vm5, 4294967295, %v1270_v19  ;;  %vm1078_vm11 = vmand %vm1292_vm1, %vm1008_vm5  ;;  %vm1303_vm1 = vcmp.eq.s32.totalorder %v968_v13, 9  ;;  %v1315_v41 = vmov 0  ;;  %v1324_v44 = vmov 0 }
 0x454   :  { %v926_v51 = vmax.f32 %v525_v46, %v532_v49  ;;  %v928_v52 = vmax.f32 %v526_v48, %v533_v50  ;;  %v1294_v31 = vsel %vm1078_vm11, 4294967295, %v1293_v31  ;;  %vm1109_vm11 = vmand %vm1305_vm14, %vm1304_vm2  ;;  %vm1317_vm2 = vnez %v1271_v19 }
 0x455   :  { %v1307_v36 = vsel %vm1109_vm11, 4294967295, %v1306_v36  ;;  %vm1128_vm14 = vmand %vm508_vm8, %vm510_vm12  ;;  %vm584_vm12 = vcmp.eq.s32.totalorder %v965_v12, 13  ;;  %v374_v45 = vsel %vm368_vm13, %v804_v47, 0.0  ;;  %v375_v46 = vsel %vm369_vm7, %v808_v57, 0.0 }
 0x456   :  { %556 = vrot.lane.b32.xlu1 %v928_v52, %s717_s11  ;;  %554 = vrot.lane.b32.xlu0 %v926_v51, %s717_s11  ;;  %v1316_v41 = vsel %vm1128_vm14, 4294967295, %v1315_v41  ;;  %vm564_vm11 = vmand %vm562_vm4, %vm1317_vm2  ;;  %vm567_vm14 = vcmp.lt.s32.totalorder %v746_v6, 5  ;;  %v1329_v50 = vmov 0  ;;  %vm606_vm13 = vcmp.eq.s32.totalorder %v965_v12, 15 }
 0x457   :  { %vm1151_vm2 = vmand %vm564_vm11, %vm566_vm9  ;;  %vm1328_vm11 = vnez %v1269_v18  ;;  %vm1331_vm7 = vnez %v1273_v22 }
 0x458   :  { %v1325_v44 = vsel %vm1151_vm2, 4294967295, %v1324_v44  ;;  %v398_v49 = vsel %vm1328_vm11, %v823_v63, %v375_v46  ;;  %vm1336_vm11 = vnez %v1283_v28  ;;  %vm610_vm2 = vcmp.lt.s32.totalorder %v743_v5, 1 }
 0x4c8   :  { %v557_v53 = vpop.permute.xlu1 %556  ;;  %v555_v54 = vpop.permute.xlu0 %554 }
 0x4c9   :  { %v558_v55 = vsel %vm1261_vm6, %v555_v54, %v557_v53  ;;  %v559_v56 = vsel %vm1261_vm6, %v557_v53, %v555_v54 }
 0x4ca   :  { %v939_v58 = vmax.f32 %v926_v51, %v558_v55  ;;  %v942_v59 = vmax.f32 %v928_v52, %v559_v56 }
 0x4cc   :  { %578 = vrot.lane.b32.xlu0 %v942_v59, %s717_s11  ;;  %576 = vrot.lane.b32.xlu2 %v939_v58, %s717_s11 }
 0x526   :  { %v577_v60 = vpop.permute.xlu2 %576 }
 0x53e   :  { %v579_v62 = vpop.permute.xlu0 %578 }
 0x53f   :  { %v580_v0 = vsel %vm1261_vm6, %v577_v60, %v579_v62  ;;  %v581_v2 = vsel %vm1261_vm6, %v579_v62, %v577_v60  ;;  %vm1031_vm6 = vcmp.eq.s32.totalorder %v539_v16, 0 }
 0x540   :  { %v953_v4 = vmax.f32 %v939_v58, %v580_v0  ;;  %v956_v8 = vmax.f32 %v942_v59, %v581_v2  ;;  %v1278_v24 = vsel %vm1031_vm6, 4294967295, %v1277_v24  ;;  %vm543_vm3 = vmand %vm1303_vm1, %vm1031_vm6  ;;  %vm563_vm1 = vcmp.eq.s32.totalorder %v968_v13, 11 }
 0x541   :  { %vm1312_vm6 = vcmp.eq.s32.totalorder %v965_v12, 7  ;;  %vm1323_vm4 = vnez %v1278_v24 }
 0x542   :  { %600 = vrot.lane.b32.xlu2 %v956_v8, %s717_s11  ;;  %598 = vrot.lane.b32.xlu1 %v953_v4, %s717_s11  ;;  %vm1124_vm5 = vmand %vm1312_vm6, %vm509_vm10  ;;  %vm1318_vm6 = vnez %v1294_v31 }
 0x543   :  { %v1314_v40 = vsel %vm1124_vm5, 4294967295, %v1313_v40  ;;  %vm1139_vm10 = vmand %vm1318_vm6, %vm544_vm15  ;;  %vm585_vm15 = vcmp.eq.s32.totalorder %v968_v13, 13  ;;  %vm588_vm6 = vcmp.lt.s32.totalorder %v743_v5, 3 }
 0x544   :  { %vm1143_vm5 = vmand %vm543_vm3, %vm545_vm0  ;;  %vm1326_vm3 = vnez %v1271_v19 }
 0x545   :  { %vm565_vm8 = vmand %vm563_vm1, %vm1323_vm4  ;;  %vm1327_vm1 = vnez %v1267_v17 }
 0x546   :  { %vm586_vm0 = vmand %vm584_vm12, %vm1326_vm3  ;;  %v397_v48 = vsel %vm1327_vm1, %v816_v61, %v374_v45  ;;  %vm1332_vm12 = vnez %v1276_v23 }
 0x547   :  { %vm1167_vm9 = vmand %vm565_vm8, %vm567_vm14  ;;  %v417_v47 = vsel %vm1331_vm7, %v830_v7, %v397_v48  ;;  %v418_v57 = vsel %vm1332_vm12, %v837_v9, %v398_v49  ;;  %vm607_vm14 = vcmp.eq.s32.totalorder %v968_v13, 15  ;;  %vm1335_vm8 = vnez %v1281_v25 }
 0x548   :  { %v1330_v50 = vsel %vm1167_vm9, 4294967295, %v1329_v50  ;;  %vm1180_vm1 = vmand %vm585_vm15, %vm1323_vm4  ;;  %v437_v63 = vsel %vm1335_vm8, %v846_v14, %v417_v47  ;;  %v438_v7 = vsel %vm1336_vm11, %v849_v15, %v418_v57  ;;  %vm589_vm7 = vcmp.lt.s32.totalorder %v746_v6, 3 }
 0x549   :  { %vm1192_vm9 = vmand %vm586_vm0, %vm588_vm6  ;;  %vm1339_vm15 = vnez %v1287_v29  ;;  %vm1340_vm12 = vnez %v1291_v30  ;;  %vm1341_vm11 = vnez %v1298_v34  ;;  %vm1342_vm0 = vnez %v1302_v35 }
 0x54a   :  { %v457_v53 = vsel %vm1339_vm15, %v860_v20, %v437_v63  ;;  %v458_v54 = vsel %vm1340_vm12, %v863_v21, %v438_v7  ;;  %vm608_vm8 = vmand %vm606_vm13, %vm1326_vm3  ;;  %vm611_vm15 = vcmp.lt.s32.totalorder %v746_v6, 1  ;;  %vm1343_vm12 = vnez %v1307_v36 }
 0x54b   :  { %v477_v14 = vsel %vm1341_vm11, %v874_v26, %v457_v53  ;;  %v478_v15 = vsel %vm1342_vm0, %v877_v27, %v458_v54  ;;  %vm609_vm6 = vmand %vm607_vm14, %vm1323_vm4  ;;  %vm1344_vm3 = vnez %v1311_v37  ;;  %vm1347_vm11 = vnez %v1316_v41 }
 0x54c   :  { %v497_v20 = vsel %vm1343_vm12, %v888_v32, %v477_v14  ;;  %v498_v5 = vsel %vm1344_vm3, %v891_v33, %v478_v15  ;;  %vm1222_vm13 = vmand %vm1180_vm1, %vm589_vm7  ;;  %vm1348_vm4 = vnez %v1314_v40  ;;  %vm1349_vm1 = vcmp.lt.s32.totalorder %v732_v1, 96 }
 0x54d   :  { %v518_v26 = vsel %vm1347_vm11, %v905_v39, %v498_v5  ;;  %v517_v6 = vsel %vm1348_vm4, %v902_v38, %v497_v20  ;;  %vm612_vm14 = vmand %vm608_vm8, %vm610_vm2  ;;  %vm1351_vm2 = vnez %v1325_v44 }
 0x54e   :  { %v552_v33 = vsel %vm1139_vm10, %v926_v51, %v517_v6  ;;  %v553_v55 = vsel %vm1143_vm5, %v928_v52, %v518_v26  ;;  %vm1350_vm7 = vmmov %vm1349_vm1  ;;  %vm1352_vm5 = vnez %v1330_v50 }
 0x54f   :  { %vm613_vm0 = vmand %vm609_vm6, %vm611_vm15  ;;  %v574_v38 = vsel %vm1351_vm2, %v939_v58, %v552_v33  ;;  %v575_v51 = vsel %vm1352_vm5, %v942_v59, %v553_v55 }
 0x550   :  { %v596_v60 = vsel %vm1192_vm9, %v953_v4, %v574_v38  ;;  %v597_v62 = vsel %vm1222_vm13, %v956_v8, %v575_v51 }
 0x59c   :  { %v601_v27 = vpop.permute.xlu2 %600 }
 0x5b4   :  { %v599_v32 = vpop.permute.xlu1 %598 }
 0x5b5   :  { %v602_v56 = vsel %vm1349_vm1, %v599_v32, %v601_v27  ;;  %v603_v39 = vsel %vm1350_vm7, %v601_v27, %v599_v32 }
 0x5b6   :  { %v604_v52 = vmax.f32 %v953_v4, %v602_v56  ;;  %v605_v1 = vmax.f32 %v956_v8, %v603_v39 }
 0x5b8   :  { %v618_v0 = vsel %vm612_vm14, %v604_v52, %v596_v60  ;;  %v619_v2 = vsel %vm613_vm0, %v605_v1, %v597_v62 }
 0x5b9   :  { %620 = vst [vmem:[#allocation5] sm:$0xff] %v618_v0 }
 0x5ba   :  { %621 = vst [vmem:[#allocation5 + $0x8] sm:$0xff] %v619_v2 }
 0x5bb   :  { %632 = dma.vmem_to_hbm [thread:$0]  %s628_s13, 256, %s630_s16, [#allocation4]  }
 0x5bc   :  { %711 = dma.done.wait [#allocation4], 256  }
 0x5bd   :  { %712 = vsyncadd [#allocation4], 4294967040 }
 0x5be   :  { %637 = vsyncpa [#allocation3], 1 }
 0x5bf   :  { %638 = vsyncpa [#allocation4], 1 }

</bundles_post_ra>
